<compile_context>
chip_gen: v5e
topology: v5e:2x2
jax: 0.10.0
libtpu: 0.0.40
codegen_flags: <defaults>
</compile_context>

<pallas_src>
import functools

import jax
import jax.numpy as jnp
from jax.experimental import pallas as pl
from jax.experimental.pallas import tpu as pltpu


def _round_up(x: int, m: int) -> int:
    return (x + m - 1) // m * m


# ---------------------------------------------------------------------------
# Kernels
# ---------------------------------------------------------------------------
def _linear_single_kernel(x_ref, w_ref, b_ref, o_ref):
    # Whole problem resident in VMEM: one MXU dot, bias add, store.
    x = x_ref[...].astype(w_ref.dtype)  # in-kernel activation cast (VPU)
    acc = jnp.dot(x, w_ref[...], preferred_element_type=jnp.float32)
    o_ref[...] = (acc + b_ref[...]).astype(o_ref.dtype)


def _linear_tiled_kernel_f32out(x_ref, w_ref, b_ref, o_ref):
    # f32 output: accumulate directly into the resident output block.
    # K is the LAST grid axis and o's index_map ignores k, so o_ref stays in VMEM
    # across all k steps of one (i, j) block (no scratch, no finalize copy).
    @pl.when(pl.program_id(2) == 0)
    def _init():
        # Bias folded into the accumulator init.
        o_ref[...] = jnp.broadcast_to(b_ref[...], o_ref.shape)

    o_ref[...] += jnp.dot(
        x_ref[...].astype(w_ref.dtype), w_ref[...],
        preferred_element_type=jnp.float32,
    )


def _linear_tiled_kernel_accout(x_ref, w_ref, b_ref, o_ref, acc_ref):
    # Narrow output dtype: keep an f32 VMEM accumulator for precision across K.
    @pl.when(pl.program_id(2) == 0)
    def _init():
        acc_ref[...] = jnp.broadcast_to(b_ref[...], acc_ref.shape)

    acc_ref[...] += jnp.dot(
        x_ref[...].astype(w_ref.dtype), w_ref[...],
        preferred_element_type=jnp.float32,
    )

    @pl.when(pl.program_id(2) == pl.num_programs(2) - 1)
    def _finalize():
        o_ref[...] = acc_ref[...].astype(o_ref.dtype)


# ---------------------------------------------------------------------------
# Wrapper: y = x @ W + b
# ---------------------------------------------------------------------------
@functools.partial(
    jax.jit, static_argnames=("tm", "tn", "tk", "single_block_bytes")
)
def pallas_linear(x, w, b, *, tm=256, tn=512, tk=512,
                  single_block_bytes=4 * 1024 * 1024):
    """x: [M, K] (f32), w: [K, N] (bf16 or f32), b: [N] or [1, N] -> [M, N] (x.dtype)."""
    M, K = x.shape
    K2, N = w.shape
    assert K == K2, (K, K2)
    out_dtype = x.dtype
    b = jnp.asarray(b).reshape(1, N).astype(jnp.float32)  # bias stays f32

    bytes_x = x.size * x.dtype.itemsize
    bytes_w = w.size * w.dtype.itemsize
    bytes_b = b.size * 4
    bytes_o = M * N * jnp.dtype(out_dtype).itemsize
    cost = pl.CostEstimate(
        flops=2 * M * K * N,
        transcendentals=0,
        bytes_accessed=bytes_x + bytes_w + bytes_b + bytes_o,
    )

    # ---- fast path: everything fits comfortably in VMEM -> single-shot kernel ----
    if bytes_x + bytes_w + bytes_b + bytes_o <= single_block_bytes:
        return pl.pallas_call(
            _linear_single_kernel,
            out_shape=jax.ShapeDtypeStruct((M, N), out_dtype),
            grid=(1,),
            in_specs=[
                pl.BlockSpec((M, K), lambda i: (0, 0)),
                pl.BlockSpec((K, N), lambda i: (0, 0)),
                pl.BlockSpec((1, N), lambda i: (0, 0)),
            ],
            out_specs=pl.BlockSpec((M, N), lambda i: (0, 0)),
            cost_estimate=cost,
        )(x, w, b)

    # ---- tiled path ----
    # Clamp tiles so small dims don't get massively over-padded.
    tm = min(tm, _round_up(M, 8))
    tn = min(tn, _round_up(N, 128))
    tk = min(tk, _round_up(K, 128))

    Mp, Kp, Np = _round_up(M, tm), _round_up(K, tk), _round_up(N, tn)
    # Static no-ops when shapes are already tile multiples (the common case);
    # in steady state pad W/b once at model init so x never needs a per-call pad.
    if (Mp, Kp) != (M, K):
        x = jnp.pad(x, ((0, Mp - M), (0, Kp - K)))
    if (Kp, Np) != (K, N):
        w = jnp.pad(w, ((0, Kp - K), (0, Np - N)))
    if Np != N:
        b = jnp.pad(b, ((0, 0), (0, Np - N)))

    grid = (Mp // tm, Np // tn, Kp // tk)  # K last ("arbitrary" reduction axis)

    if out_dtype == jnp.float32:
        kernel, scratch = _linear_tiled_kernel_f32out, []
    else:
        kernel, scratch = _linear_tiled_kernel_accout, [pltpu.VMEM((tm, tn), jnp.float32)]

    out_padded = pl.pallas_call(
        kernel,
        out_shape=jax.ShapeDtypeStruct((Mp, Np), out_dtype),
        grid_spec=pltpu.PrefetchScalarGridSpec(
            num_scalar_prefetch=0,
            grid=grid,
            in_specs=[
                pl.BlockSpec((tm, tk), lambda i, j, k: (i, k)),  # x tile
                pl.BlockSpec((tk, tn), lambda i, j, k: (k, j)),  # w tile
                pl.BlockSpec((1, tn), lambda i, j, k: (0, j)),   # bias (k-invariant)
            ],
            out_specs=pl.BlockSpec((tm, tn), lambda i, j, k: (i, j)),
            scratch_shapes=scratch,
        ),
        compiler_params=pltpu.CompilerParams(
            dimension_semantics=("parallel", "parallel", "arbitrary"),
        ),
        cost_estimate=cost,
    )(x, w, b)

    if (Mp, Np) != (M, N):
        out_padded = out_padded[:M, :N]
    return out_padded


# ---------------------------------------------------------------------------
# Inner "model" whose forward is the Pallas kernel above.
# ---------------------------------------------------------------------------
class InnerLinearModel:
    """y = x @ W + b.  W is stored persistently in `operand_dtype` (bf16 default:
    halves weight HBM traffic and hits v6e/v7x MXU bf16 peak); bias stays f32; the
    activation is cast in-kernel (VPU), never via a wrapper-side astype pass."""

    def __init__(self, in_features, out_features, key, operand_dtype=jnp.bfloat16):
        kw, kb = jax.random.split(key)
        bound = 1.0 / (in_features ** 0.5)
        w = jax.random.uniform(
            kw, (in_features, out_features), jnp.float32, -bound, bound
        )
        self.w = w.astype(operand_dtype)
        self.b = jax.random.uniform(kb, (1, out_features), jnp.float32, -bound, bound)

    def __call__(self, x):
        return pallas_linear(x, self.w, self.b)


# ---------------------------------------------------------------------------
# DummyDDP: exact semantics of the PyTorch wrapper — pure passthrough.
# ---------------------------------------------------------------------------
class DummyDDP:
    def __init__(self, model):
        self.module = model

    def __call__(self, *inputs, **kwargs):
        return self.module(*inputs, **kwargs)

    forward = __call__  # mirror nn.Module.forward


if __name__ == "__main__":
    key = jax.random.PRNGKey(0)
    k_p1, k_p2, k_x1, k_x2 = jax.random.split(key, 4)

    # --- 1) small layer: hits the single-shot VMEM-resident fast path ---
    m1, kin1, n1 = 128, 256, 256
    inner_small = InnerLinearModel(kin1, n1, k_p1)          # bf16 weights (default)
    model = DummyDDP(inner_small)
    x1 = jax.random.normal(k_x1, (m1, kin1), jnp.float32)
    y1 = jax.block_until_ready(model(x1))
    ref1 = jnp.dot(
        x1.astype(jnp.bfloat16).astype(jnp.float32),
        inner_small.w.astype(jnp.float32),
        precision=jax.lax.Precision.HIGHEST,
    ) + inner_small.b
    assert y1.shape == (m1, n1) and y1.dtype == jnp.float32
    assert jnp.allclose(y1, ref1, atol=2e-3, rtol=2e-3)

    # --- 2) larger layer: tiled path, 2x2x2 grid with tm=256, tn=tk=512 tiles ---
    m2, kin2, n2 = 512, 1024, 1024
    inner_big = InnerLinearModel(kin2, n2, k_p2)
    model_big = DummyDDP(inner_big)
    x2 = jax.random.normal(k_x2, (m2, kin2), jnp.float32)
    y2 = jax.block_until_ready(model_big(x2))
    ref2 = jnp.dot(
        x2.astype(jnp.bfloat16).astype(jnp.float32),
        inner_big.w.astype(jnp.float32),
        precision=jax.lax.Precision.HIGHEST,
    ) + inner_big.b
    assert y2.shape == (m2, n2) and y2.dtype == jnp.float32
    assert jnp.allclose(y2, ref2, atol=2e-3, rtol=2e-3)

    # --- 3) f32-weight path sanity (operand cast is a no-op inside the kernel) ---
    inner_f32 = InnerLinearModel(kin1, n1, k_p1, operand_dtype=jnp.float32)
    y3 = jax.block_until_ready(DummyDDP(inner_f32)(x1))
    ref3 = jnp.dot(x1, inner_f32.w, precision=jax.lax.Precision.HIGHEST) + inner_f32.b
    # Tolerance covers MXU default f32 matmul precision (bf16-pass dependent).
    assert jnp.allclose(y3, ref3, atol=2e-2, rtol=2e-2)

    print("KERNEL_OK")
</pallas_src>

<mosaic_0001>
module attributes {stable_mosaic.version = 11 : i64} {
  func.func @_linear_single_kernel(%arg0: i32, %arg1: memref<128x256xf32, #tpu.memory_space<vmem>>, %arg2: memref<256x256xbf16, #tpu.memory_space<vmem>>, %arg3: memref<1x256xf32, #tpu.memory_space<vmem>>, %arg4: memref<128x256xf32, #tpu.memory_space<vmem>>) attributes {dimension_semantics = [#tpu.dimension_semantics<arbitrary>], iteration_bounds = array<i64: 1>, scalar_prefetch = 0 : i64, scratch_operands = 0 : i64, tpu.core_type = #tpu.core_type<tc>, window_params = [{pipeline_mode = #tpu.pipeline_mode<synchronous>, transform_indices = @transform_0, window_bounds = array<i64: 128, 256>}, {pipeline_mode = #tpu.pipeline_mode<synchronous>, transform_indices = @transform_1, window_bounds = array<i64: 256, 256>}, {pipeline_mode = #tpu.pipeline_mode<synchronous>, transform_indices = @transform_2, window_bounds = array<i64: 1, 256>}, {pipeline_mode = #tpu.pipeline_mode<synchronous>, transform_indices = @transform_3, window_bounds = array<i64: 128, 256>}]} {
    %c0 = arith.constant 0 : index
    %c0_0 = arith.constant 0 : index
    %0 = vector.load %arg1[%c0, %c0_0] : memref<128x256xf32, #tpu.memory_space<vmem>>, vector<128x256xf32>
    %1 = arith.truncf %0 : vector<128x256xf32> to vector<128x256xbf16>
    %c0_1 = arith.constant 0 : index
    %c0_2 = arith.constant 0 : index
    %2 = vector.load %arg2[%c0_1, %c0_2] : memref<256x256xbf16, #tpu.memory_space<vmem>>, vector<256x256xbf16>
    %cst = arith.constant dense<0.000000e+00> : vector<128x256xf32>
    %3 = tpu.matmul %1, %2, %cst {dimension_numbers = #tpu.dot_dimension_numbers<[1], [0], [0], [1], [0, 0, 1, 1], [], []>} : vector<128x256xbf16>, vector<256x256xbf16>, vector<128x256xf32> -> vector<128x256xf32>
    %c0_3 = arith.constant 0 : index
    %c0_4 = arith.constant 0 : index
    %4 = vector.load %arg3[%c0_3, %c0_4] : memref<1x256xf32, #tpu.memory_space<vmem>>, vector<1x256xf32>
    %5 = vector.broadcast %4 : vector<1x256xf32> to vector<128x256xf32>
    %6 = arith.addf %3, %5 : vector<128x256xf32>
    %c0_5 = arith.constant 0 : index
    %c0_6 = arith.constant 0 : index
    %7 = vector.load %arg4[%c0_5, %c0_6] : memref<128x256xf32, #tpu.memory_space<vmem>>, vector<128x256xf32>
    tpu.vector_store %arg4[%c0_5, %c0_6], %6 {strides = array<i32>} : memref<128x256xf32, #tpu.memory_space<vmem>>, vector<128x256xf32>,
    return
  }
  func.func @transform_0(%arg0: i32) -> (i32, i32) {
    %c0_i32 = arith.constant 0 : i32
    %c0_i32_0 = arith.constant 0 : i32
    %c0_i32_1 = arith.constant 0 : i32
    return %c0_i32, %c0_i32_0 : i32, i32
  }
  func.func @transform_1(%arg0: i32) -> (i32, i32) {
    %c0_i32 = arith.constant 0 : i32
    %c0_i32_0 = arith.constant 0 : i32
    %c0_i32_1 = arith.constant 0 : i32
    return %c0_i32, %c0_i32_0 : i32, i32
  }
  func.func @transform_2(%arg0: i32) -> (i32, i32) {
    %c0_i32 = arith.constant 0 : i32
    %c0_i32_0 = arith.constant 0 : i32
    %c0_i32_1 = arith.constant 0 : i32
    return %c0_i32, %c0_i32_0 : i32, i32
  }
  func.func @transform_3(%arg0: i32) -> (i32, i32) {
    %c0_i32 = arith.constant 0 : i32
    %c0_i32_0 = arith.constant 0 : i32
    %c0_i32_1 = arith.constant 0 : i32
    return %c0_i32, %c0_i32_0 : i32, i32
  }
}

</mosaic_0001>

<bundles_post_ra>
// kernel: pallas_linear.1
= control target key start
LH: loop header
LB: loop body
LE: loop exit
PB: predicated region body
PF: predicated region fallthrough
CT: control target
= control target key end

     0   :  { %8 = vsyncpa [#allocation3], 0  ;;  %s906_s0 = inlined_call_operand.hbm [shape: f32[128,256], index: 0, kind: input, shape index: {}]   ;;  %s907_s1 = inlined_call_operand.hbm [shape: bf16[256,256], index: 1, kind: input, shape index: {}]   ;;  %s908_s2 = inlined_call_operand.hbm [shape: f32[1,256], index: 2, kind: input, shape index: {}]   ;;  %s909_s3 = inlined_call_operand.hbm [shape: f32[128,256], index: 3, kind: output, shape index: {}]  }
   0x1   :  { %9 = vsyncpa [#allocation6], 0  ;;  %s28_s14 = sshll.u32 %s907_s1, 4  ;;  %s29_s14 = int_to_ptr.hbm [resolvable:$true] %s28_s14 }
   0x2   :  { %10 = vsyncpa [#allocation4], 0  ;;  %s824_s15 = smov [#allocation5]   ;;  %s15_s19 = sshll.u32 %s906_s0, 4  ;;  %s16_s19 = int_to_ptr.hbm [resolvable:$true] %s15_s19 }
   0x3   :  { %s30_s16 = sshll.u32 %s824_s15, 4  ;;  %s825_s20 = smov 128   ;;  %s31_s16 = int_to_ptr.vmem [resolvable:$true] %s30_s16 }
   0x4   :  { %s826_s21 = smov 8   ;;  %s827_s22 = smov [#allocation2]  }
   0x5   :  { %36 = dma.hbm_to_vmem [thread:$0]  %s29_s14, 4096, %s31_s16, [#allocation6], %s825_s20, %s825_s20, %s826_s21  }
   0x6   :  { %s17_s23 = sshll.u32 %s827_s22, 4  ;;  %s828_s24 = smov 256   ;;  %s18_s23 = int_to_ptr.vmem [resolvable:$true] %s17_s23 }
   0x7   :  { %s829_s25 = smov 16   ;;  %s42_s27 = sshll.u32 %s908_s2, 4  ;;  %s43_s27 = int_to_ptr.hbm [resolvable:$true] %s42_s27 }
   0x8   :  { %23 = dma.hbm_to_vmem [thread:$0]  %s16_s19, 4096, %s18_s23, [#allocation3], %s828_s24, %s828_s24, %s829_s25  }
   0x9   :  { %s830_s28 = smov [#allocation7]  }
   0xa   :  { %s44_s0 = sshll.u32 %s830_s28, 4  ;;  %s45_s0 = int_to_ptr.vmem [resolvable:$true] %s44_s0 }
   0xb   :  { %47 = dma.hbm_to_vmem [thread:$0]  %s43_s27, 32, %s45_s0, [#allocation6]  }
   0xc   :  { %818 = dma.done.wait [#allocation3], 4096  }
   0xd   :  { %819 = vsyncadd [#allocation3], 4294963200 }
   0xe   :  { %820 = dma.done.wait [#allocation6], 4128  }
   0xf   :  { %821 = vsyncadd [#allocation6], 4294963168  ;;  %v612_v0 = vld [vmem:[#allocation5 + $0x70] sm:$0xf]  ;;  %v697_v1 = vld [vmem:[#allocation5 + $0x74] sm:$0xf0] }
  0x10   :  { %v676_v2 = vld [vmem:[#allocation5 + $0xf0] sm:$0xf]  ;;  %v613_v3 = vor.u32 %v697_v1, %v612_v0  ;;  %v713_v4 = vld [vmem:[#allocation5 + $0xf4] sm:$0xf0]  ;;  %v696_v5 = vld [vmem:[#allocation5 + $0x74] sm:$0xf] }
  0x11   :  { %v614_v6 = vld [vmem:[#allocation5 + $0x78] sm:$0xf0]  ;;  %v677_v7 = vor.u32 %v713_v4, %v676_v2  ;;  %v712_v9 = vld [vmem:[#allocation5 + $0xf4] sm:$0xf]  ;;  %v604_v11 = vld [vmem:[#allocation5 + $0x60] sm:$0xf] }
  0x12   :  { %v617_v8 = vor.u32 %v696_v5, %v614_v6  ;;  %v678_v10 = vld [vmem:[#allocation5 + $0xf8] sm:$0xf0]  ;;  %306 = vmatpush.bf16.msra.mxu0 %v613_v3  ;;  %v695_v13 = vld [vmem:[#allocation5 + $0x64] sm:$0xf0]  ;;  %v668_v14 = vld [vmem:[#allocation5 + $0xe0] sm:$0xf] }
  0x13   :  { %v681_v12 = vor.u32 %v712_v9, %v678_v10  ;;  %v711_v15 = vld [vmem:[#allocation5 + $0xe4] sm:$0xf0]  ;;  %355 = vmatpush.bf16.msra.mxu1 %v677_v7  ;;  %v605_v16 = vor.u32 %v695_v13, %v604_v11  ;;  %v694_v18 = vld [vmem:[#allocation5 + $0x64] sm:$0xf]  ;;  %v606_v19 = vld [vmem:[#allocation5 + $0x68] sm:$0xf0] }
  0x14   :  { %404 = vmatpush.bf16.msra.mxu2 %v617_v8  ;;  %v669_v17 = vor.u32 %v711_v15, %v668_v14  ;;  %v710_v20 = vld [vmem:[#allocation5 + $0xe4] sm:$0xf]  ;;  %v609_v21 = vor.u32 %v694_v18, %v606_v19  ;;  %v670_v22 = vld [vmem:[#allocation5 + $0xe8] sm:$0xf0]  ;;  %v596_v23 = vld [vmem:[#allocation5 + $0x50] sm:$0xf] }
  0x15   :  { %453 = vmatpush.bf16.msra.mxu3 %v681_v12  ;;  %v693_v24 = vld [vmem:[#allocation5 + $0x54] sm:$0xf0]  ;;  %v673_v25 = vor.u32 %v710_v20, %v670_v22  ;;  %v660_v26 = vld [vmem:[#allocation5 + $0xd0] sm:$0xf]  ;;  %v692_v28 = vld [vmem:[#allocation5 + $0x54] sm:$0xf] }
  0x16   :  { %v709_v27 = vld [vmem:[#allocation5 + $0xd4] sm:$0xf0]  ;;  %307 = vmatpush.bf16.msra.mxu0 %v605_v16  ;;  %v597_v29 = vor.u32 %v693_v24, %v596_v23  ;;  %v598_v30 = vld [vmem:[#allocation5 + $0x58] sm:$0xf0]  ;;  %v708_v31 = vld [vmem:[#allocation5 + $0xd4] sm:$0xf] }
  0x17   :  { %v662_v32 = vld [vmem:[#allocation5 + $0xd8] sm:$0xf0]  ;;  %356 = vmatpush.bf16.msra.mxu1 %v669_v17  ;;  %v661_v33 = vor.u32 %v709_v27, %v660_v26  ;;  %v601_v34 = vor.u32 %v692_v28, %v598_v30  ;;  %v588_v35 = vld [vmem:[#allocation5 + $0x40] sm:$0xf]  ;;  %v691_v36 = vld [vmem:[#allocation5 + $0x44] sm:$0xf0] }
  0x18   :  { %405 = vmatpush.bf16.msra.mxu2 %v609_v21  ;;  %v652_v37 = vld [vmem:[#allocation5 + $0xc0] sm:$0xf]  ;;  %v665_v38 = vor.u32 %v708_v31, %v662_v32  ;;  %v707_v39 = vld [vmem:[#allocation5 + $0xc4] sm:$0xf0]  ;;  %v690_v40 = vld [vmem:[#allocation5 + $0x44] sm:$0xf]  ;;  %v589_v44 = vor.u32 %v691_v36, %v588_v35 }
  0x19   :  { %454 = vmatpush.bf16.msra.mxu3 %v673_v25  ;;  %v590_v41 = vld [vmem:[#allocation5 + $0x48] sm:$0xf0]  ;;  %v706_v42 = vld [vmem:[#allocation5 + $0xc4] sm:$0xf]  ;;  %v653_v45 = vor.u32 %v707_v39, %v652_v37  ;;  %v580_v47 = vld [vmem:[#allocation5 + $0x30] sm:$0xf] }
  0x1a   :  { %v654_v43 = vld [vmem:[#allocation5 + $0xc8] sm:$0xf0]  ;;  %308 = vmatpush.bf16.msra.mxu0 %v597_v29  ;;  %v593_v46 = vor.u32 %v690_v40, %v590_v41  ;;  %v689_v48 = vld [vmem:[#allocation5 + $0x34] sm:$0xf0]  ;;  %v644_v49 = vld [vmem:[#allocation5 + $0xb0] sm:$0xf] }
  0x1b   :  { %357 = vmatpush.bf16.msra.mxu1 %v661_v33  ;;  %v657_v50 = vor.u32 %v706_v42, %v654_v43  ;;  %v705_v51 = vld [vmem:[#allocation5 + $0xb4] sm:$0xf0]  ;;  %v688_v52 = vld [vmem:[#allocation5 + $0x34] sm:$0xf]  ;;  %v582_v53 = vld [vmem:[#allocation5 + $0x38] sm:$0xf0]  ;;  %v581_v56 = vor.u32 %v689_v48, %v580_v47 }
  0x1c   :  { %406 = vmatpush.bf16.msra.mxu2 %v601_v34  ;;  %v704_v54 = vld [vmem:[#allocation5 + $0xb4] sm:$0xf]  ;;  %v646_v55 = vld [vmem:[#allocation5 + $0xb8] sm:$0xf0]  ;;  %v645_v57 = vor.u32 %v705_v51, %v644_v49  ;;  %v585_v58 = vor.u32 %v688_v52, %v582_v53  ;;  %v572_v59 = vld [vmem:[#allocation5 + $0x20] sm:$0xf] }
  0x1d   :  { %455 = vmatpush.bf16.msra.mxu3 %v665_v38  ;;  %v687_v60 = vld [vmem:[#allocation5 + $0x24] sm:$0xf0]  ;;  %v636_v61 = vld [vmem:[#allocation5 + $0xa0] sm:$0xf]  ;;  %v649_v62 = vor.u32 %v704_v54, %v646_v55  ;;  %v686_v0 = vld [vmem:[#allocation5 + $0x24] sm:$0xf] }
  0x1e   :  { %309 = vmatpush.bf16.msra.mxu0 %v589_v44  ;;  %v703_v63 = vld [vmem:[#allocation5 + $0xa4] sm:$0xf0]  ;;  %v574_v1 = vld [vmem:[#allocation5 + $0x28] sm:$0xf0]  ;;  %v702_v2 = vld [vmem:[#allocation5 + $0xa4] sm:$0xf]  ;;  %v573_v4 = vor.u32 %v687_v60, %v572_v59 }
  0x1f   :  { %358 = vmatpush.bf16.msra.mxu1 %v653_v45  ;;  %v638_v3 = vld [vmem:[#allocation5 + $0xa8] sm:$0xf0]  ;;  %v637_v5 = vor.u32 %v703_v63, %v636_v61  ;;  %v577_v6 = vor.u32 %v686_v0, %v574_v1  ;;  %v564_v7 = vld [vmem:[#allocation5 + $0x10] sm:$0xf]  ;;  %v685_v8 = vld [vmem:[#allocation5 + $0x14] sm:$0xf0] }
  0x20   :  { %407 = vmatpush.bf16.msra.mxu2 %v593_v46  ;;  %v628_v9 = vld [vmem:[#allocation5 + $0x90] sm:$0xf]  ;;  %v641_v10 = vor.u32 %v702_v2, %v638_v3  ;;  %v701_v11 = vld [vmem:[#allocation5 + $0x94] sm:$0xf0]  ;;  %v684_v12 = vld [vmem:[#allocation5 + $0x14] sm:$0xf]  ;;  %v565_v16 = vor.u32 %v685_v8, %v564_v7 }
  0x21   :  { %456 = vmatpush.bf16.msra.mxu3 %v657_v50  ;;  %v566_v13 = vld [vmem:[#allocation5 + $0x18] sm:$0xf0]  ;;  %v700_v14 = vld [vmem:[#allocation5 + $0x94] sm:$0xf]  ;;  %v629_v17 = vor.u32 %v701_v11, %v628_v9  ;;  %v556_v19 = vld [vmem:[#allocation5] sm:$0xf] }
  0x22   :  { %310 = vmatpush.bf16.msra.mxu0 %v581_v56  ;;  %v630_v15 = vld [vmem:[#allocation5 + $0x98] sm:$0xf0]  ;;  %v569_v18 = vor.u32 %v684_v12, %v566_v13  ;;  %v683_v20 = vld [vmem:[#allocation5 + $0x4] sm:$0xf0]  ;;  %v620_v21 = vld [vmem:[#allocation5 + $0x80] sm:$0xf] }
  0x23   :  { %359 = vmatpush.bf16.msra.mxu1 %v645_v57  ;;  %v633_v22 = vor.u32 %v700_v14, %v630_v15  ;;  %v699_v23 = vld [vmem:[#allocation5 + $0x84] sm:$0xf0]  ;;  %v682_v24 = vld [vmem:[#allocation5 + $0x4] sm:$0xf]  ;;  %v558_v25 = vld [vmem:[#allocation5 + $0x8] sm:$0xf0]  ;;  %v557_v28 = vor.u32 %v683_v20, %v556_v19 }
  0x24   :  { %408 = vmatpush.bf16.msra.mxu2 %v585_v58  ;;  %v698_v26 = vld [vmem:[#allocation5 + $0x84] sm:$0xf]  ;;  %v622_v27 = vld [vmem:[#allocation5 + $0x88] sm:$0xf0]  ;;  %v62_v30 = vld [vmem:[#allocation2 + $0x10] sm:$0xff]  ;;  %v621_v31 = vor.u32 %v699_v23, %v620_v21  ;;  %v561_v32 = vor.u32 %v682_v24, %v558_v25  ;;  %s831_s2 = smov [#allocation8]  }
  0x25   :  { %457 = vmatpush.bf16.msra.mxu3 %v649_v62  ;;  %v60_v29 = vld [vmem:[#allocation2] sm:$0xff]  ;;  %v61_v33 = vld [vmem:[#allocation2 + $0x8] sm:$0xff]  ;;  %v63_v34 = vld [vmem:[#allocation2 + $0x18] sm:$0xff]  ;;  %v625_v35 = vor.u32 %v698_v26, %v622_v27  ;;  %s538_s29 = sshll.u32 %s831_s2, 4  ;;  %s540_s5 = sshll.u32 %s909_s3, 4  ;;  %s539_s29 = int_to_ptr.vmem [resolvable:$true] %s538_s29  ;;  %s541_s5 = int_to_ptr.hbm [resolvable:$true] %s540_s5 }
  0x26   :  { %311 = vmatpush.bf16.msra.mxu0 %v573_v4  ;;  %v92_v36 = vpack.c.bf16 %v62_v30, %v60_v29  ;;  %v93_v37 = vpack.c.bf16 %v63_v34, %v61_v33  ;;  %v64_v38 = vld [vmem:[#allocation2 + $0x20] sm:$0xff]  ;;  %v66_v39 = vld [vmem:[#allocation2 + $0x30] sm:$0xff]  ;;  %v65_v40 = vld [vmem:[#allocation2 + $0x28] sm:$0xff] }
  0x27   :  { %360 = vmatpush.bf16.msra.mxu1 %v637_v5  ;;  %v67_v41 = vld [vmem:[#allocation2 + $0x38] sm:$0xff]  ;;  %v94_v42 = vpack.c.bf16 %v66_v39, %v64_v38  ;;  %v68_v44 = vld [vmem:[#allocation2 + $0x40] sm:$0xff]  ;;  %v70_v45 = vld [vmem:[#allocation2 + $0x50] sm:$0xff] }
  0x28   :  { %409 = vmatpush.bf16.msra.mxu2 %v577_v6  ;;  %v95_v43 = vpack.c.bf16 %v67_v41, %v65_v40  ;;  %v69_v46 = vld [vmem:[#allocation2 + $0x48] sm:$0xff]  ;;  %v71_v47 = vld [vmem:[#allocation2 + $0x58] sm:$0xff]  ;;  %v96_v48 = vpack.c.bf16 %v70_v45, %v68_v44  ;;  %v72_v50 = vld [vmem:[#allocation2 + $0x60] sm:$0xff] }
  0x29   :  { %458 = vmatpush.bf16.msra.mxu3 %v641_v10  ;;  %v97_v49 = vpack.c.bf16 %v71_v47, %v69_v46  ;;  %v74_v51 = vld [vmem:[#allocation2 + $0x70] sm:$0xff]  ;;  %v73_v52 = vld [vmem:[#allocation2 + $0x68] sm:$0xff]  ;;  %v75_v53 = vld [vmem:[#allocation2 + $0x78] sm:$0xff] }
  0x2a   :  { %312 = vmatpush.bf16.msra.mxu0 %v565_v16  ;;  %v98_v54 = vpack.c.bf16 %v74_v51, %v72_v50  ;;  %v99_v55 = vpack.c.bf16 %v75_v53, %v73_v52  ;;  %v76_v56 = vld [vmem:[#allocation2 + $0x80] sm:$0xff]  ;;  %v78_v57 = vld [vmem:[#allocation2 + $0x90] sm:$0xff]  ;;  %v77_v58 = vld [vmem:[#allocation2 + $0x88] sm:$0xff] }
  0x2b   :  { %361 = vmatpush.bf16.msra.mxu1 %v629_v17  ;;  %v79_v59 = vld [vmem:[#allocation2 + $0x98] sm:$0xff]  ;;  %v100_v60 = vpack.c.bf16 %v78_v57, %v76_v56  ;;  %v80_v62 = vld [vmem:[#allocation2 + $0xa0] sm:$0xff]  ;;  %v82_v63 = vld [vmem:[#allocation2 + $0xb0] sm:$0xff] }
  0x2c   :  { %410 = vmatpush.bf16.msra.mxu2 %v569_v18  ;;  %v101_v61 = vpack.c.bf16 %v79_v59, %v77_v58  ;;  %v81_v0 = vld [vmem:[#allocation2 + $0xa8] sm:$0xff]  ;;  %v83_v1 = vld [vmem:[#allocation2 + $0xb8] sm:$0xff]  ;;  %v102_v2 = vpack.c.bf16 %v82_v63, %v80_v62  ;;  %v84_v4 = vld [vmem:[#allocation2 + $0xc0] sm:$0xff] }
  0x2d   :  { %459 = vmatpush.bf16.msra.mxu3 %v633_v22  ;;  %v103_v3 = vpack.c.bf16 %v83_v1, %v81_v0  ;;  %v86_v5 = vld [vmem:[#allocation2 + $0xd0] sm:$0xff]  ;;  %v85_v6 = vld [vmem:[#allocation2 + $0xc8] sm:$0xff]  ;;  %v87_v7 = vld [vmem:[#allocation2 + $0xd8] sm:$0xff] }
  0x2e   :  { %313 = vmatpush.bf16.msra.mxu0 %v557_v28  ;;  %v104_v8 = vpack.c.bf16 %v86_v5, %v84_v4  ;;  %v105_v9 = vpack.c.bf16 %v87_v7, %v85_v6  ;;  %v88_v10 = vld [vmem:[#allocation2 + $0xe0] sm:$0xff]  ;;  %v90_v11 = vld [vmem:[#allocation2 + $0xf0] sm:$0xff]  ;;  %v89_v12 = vld [vmem:[#allocation2 + $0xe8] sm:$0xff] }
  0x2f   :  { %362 = vmatpush.bf16.msra.mxu1 %v621_v31  ;;  %v91_v13 = vld [vmem:[#allocation2 + $0xf8] sm:$0xff]  ;;  %v106_v14 = vpack.c.bf16 %v90_v11, %v88_v10  ;;  %v140_v16 = vld [vmem:[#allocation7] sm:$0x3] }
  0x30   :  { %411 = vmatpush.bf16.msra.mxu2 %v561_v32  ;;  %v107_v15 = vpack.c.bf16 %v91_v13, %v89_v12  ;;  %v864_v17 = vperm.slane %v140_v16, 0  ;;  %v867_v22 = vperm.slane %v140_v16, 1 }
  0x31   :  { %460 = vmatpush.bf16.msra.mxu3 %v625_v35  ;;  %314 = vmatmul.bf16.vlgmr.msra.gmra.mxu0 %v92_v36 }
  0x32   :  { %363 = vmatmul.bf16.vlgmr.msra.gmra.mxu1 %v93_v37 }
  0x33   :  { %412 = vmatmul.bf16.vlgmr.msra.gmra.mxu2 %v92_v36 }
  0x34   :  { %461 = vmatmul.bf16.vlgmr.msra.gmra.mxu3 %v93_v37 }
  0x41   :  { %319 = vmatmul.bf16.gmra.mxu0 %v94_v42 }
  0x42   :  { %368 = vmatmul.bf16.gmra.mxu1 %v95_v43 }
  0x43   :  { %417 = vmatmul.bf16.gmra.mxu2 %v94_v42 }
  0x44   :  { %466 = vmatmul.bf16.gmra.mxu3 %v95_v43 }
  0x51   :  { %324 = vmatmul.bf16.gmra.mxu0 %v96_v48 }
  0x52   :  { %373 = vmatmul.bf16.gmra.mxu1 %v97_v49 }
  0x53   :  { %422 = vmatmul.bf16.gmra.mxu2 %v96_v48 }
  0x54   :  { %471 = vmatmul.bf16.gmra.mxu3 %v97_v49 }
  0x61   :  { %329 = vmatmul.bf16.gmra.mxu0 %v98_v54 }
  0x62   :  { %378 = vmatmul.bf16.gmra.mxu1 %v99_v55 }
  0x63   :  { %427 = vmatmul.bf16.gmra.mxu2 %v98_v54 }
  0x64   :  { %476 = vmatmul.bf16.gmra.mxu3 %v99_v55 }
  0x71   :  { %334 = vmatmul.bf16.gmra.mxu0 %v100_v60 }
  0x72   :  { %383 = vmatmul.bf16.gmra.mxu1 %v101_v61 }
  0x73   :  { %432 = vmatmul.bf16.gmra.mxu2 %v100_v60 }
  0x74   :  { %481 = vmatmul.bf16.gmra.mxu3 %v101_v61 }
  0x81   :  { %339 = vmatmul.bf16.gmra.mxu0 %v102_v2 }
  0x82   :  { %388 = vmatmul.bf16.gmra.mxu1 %v103_v3 }
  0x83   :  { %437 = vmatmul.bf16.gmra.mxu2 %v102_v2 }
  0x84   :  { %486 = vmatmul.bf16.gmra.mxu3 %v103_v3 }
  0x91   :  { %344 = vmatmul.bf16.gmra.mxu0 %v104_v8 }
  0x92   :  { %393 = vmatmul.bf16.gmra.mxu1 %v105_v9 }
  0x93   :  { %442 = vmatmul.bf16.gmra.mxu2 %v104_v8 }
  0x94   :  { %491 = vmatmul.bf16.gmra.mxu3 %v105_v9 }
  0xa1   :  { %349 = vmatmul.bf16.gmra.mxu0 %v106_v14 }
  0xa2   :  { %398 = vmatmul.bf16.gmra.mxu1 %v107_v15 }
  0xa3   :  { %447 = vmatmul.bf16.gmra.mxu2 %v106_v14 }
  0xa4   :  { %496 = vmatmul.bf16.gmra.mxu3 %v107_v15 }
  0xae   :  { %v315_v18 = vpop.f32.mrf.mxu0 }
  0xaf   :  { %v316_v19 = vadd.f32 %v315_v18, %v864_v17  ;;  %v364_v20 = vpop.f32.mrf.mxu1 }
  0xb1   :  { %v365_v21 = vadd.f32 %v364_v20, %v316_v19 }
  0xb3   :  { %502 = vst [vmem:[#allocation8] sm:$0xff] %v365_v21 }
  0xb6   :  { %v413_v23 = vpop.f32.mrf.mxu2  ;;  %v317_v26 = vpop.f32.mrf.mxu0 }
  0xb7   :  { %v414_v24 = vadd.f32 %v413_v23, %v867_v22  ;;  %v462_v25 = vpop.f32.mrf.mxu3  ;;  %v318_v27 = vadd.f32 %v317_v26, %v864_v17  ;;  %v366_v28 = vpop.f32.mrf.mxu1 }
  0xb9   :  { %v463_v29 = vadd.f32 %v462_v25, %v414_v24  ;;  %v367_v30 = vadd.f32 %v366_v28, %v318_v27 }
  0xbb   :  { %503 = vst [vmem:[#allocation8 + $0x8] sm:$0xff] %v463_v29 }
  0xbc   :  { %504 = vst [vmem:[#allocation8 + $0x10] sm:$0xff] %v367_v30 }
  0xbe   :  { %v415_v31 = vpop.f32.mrf.mxu2  ;;  %v320_v34 = vpop.f32.mrf.mxu0 }
  0xbf   :  { %v416_v32 = vadd.f32 %v415_v31, %v867_v22  ;;  %v464_v33 = vpop.f32.mrf.mxu3  ;;  %v321_v35 = vadd.f32 %v320_v34, %v864_v17  ;;  %v369_v36 = vpop.f32.mrf.mxu1 }
  0xc1   :  { %v465_v37 = vadd.f32 %v464_v33, %v416_v32  ;;  %v370_v38 = vadd.f32 %v369_v36, %v321_v35 }
  0xc3   :  { %505 = vst [vmem:[#allocation8 + $0x18] sm:$0xff] %v465_v37 }
  0xc4   :  { %506 = vst [vmem:[#allocation8 + $0x20] sm:$0xff] %v370_v38 }
  0xc6   :  { %v418_v39 = vpop.f32.mrf.mxu2  ;;  %v322_v42 = vpop.f32.mrf.mxu0 }
  0xc7   :  { %v419_v40 = vadd.f32 %v418_v39, %v867_v22  ;;  %v467_v41 = vpop.f32.mrf.mxu3  ;;  %v323_v43 = vadd.f32 %v322_v42, %v864_v17  ;;  %v371_v44 = vpop.f32.mrf.mxu1 }
  0xc9   :  { %v468_v45 = vadd.f32 %v467_v41, %v419_v40  ;;  %v372_v46 = vadd.f32 %v371_v44, %v323_v43 }
  0xcb   :  { %507 = vst [vmem:[#allocation8 + $0x28] sm:$0xff] %v468_v45 }
  0xcc   :  { %508 = vst [vmem:[#allocation8 + $0x30] sm:$0xff] %v372_v46 }
  0xce   :  { %v420_v47 = vpop.f32.mrf.mxu2  ;;  %v325_v50 = vpop.f32.mrf.mxu0 }
  0xcf   :  { %v421_v48 = vadd.f32 %v420_v47, %v867_v22  ;;  %v469_v49 = vpop.f32.mrf.mxu3  ;;  %v326_v51 = vadd.f32 %v325_v50, %v864_v17  ;;  %v374_v52 = vpop.f32.mrf.mxu1 }
  0xd1   :  { %v470_v53 = vadd.f32 %v469_v49, %v421_v48  ;;  %v375_v54 = vadd.f32 %v374_v52, %v326_v51 }
  0xd3   :  { %509 = vst [vmem:[#allocation8 + $0x38] sm:$0xff] %v470_v53 }
  0xd4   :  { %510 = vst [vmem:[#allocation8 + $0x40] sm:$0xff] %v375_v54 }
  0xd6   :  { %v423_v55 = vpop.f32.mrf.mxu2  ;;  %v327_v58 = vpop.f32.mrf.mxu0 }
  0xd7   :  { %v424_v56 = vadd.f32 %v423_v55, %v867_v22  ;;  %v472_v57 = vpop.f32.mrf.mxu3  ;;  %v328_v59 = vadd.f32 %v327_v58, %v864_v17  ;;  %v376_v60 = vpop.f32.mrf.mxu1 }
  0xd9   :  { %v473_v61 = vadd.f32 %v472_v57, %v424_v56  ;;  %v377_v62 = vadd.f32 %v376_v60, %v328_v59 }
  0xdb   :  { %511 = vst [vmem:[#allocation8 + $0x48] sm:$0xff] %v473_v61 }
  0xdc   :  { %512 = vst [vmem:[#allocation8 + $0x50] sm:$0xff] %v377_v62 }
  0xde   :  { %v425_v63 = vpop.f32.mrf.mxu2  ;;  %v330_v2 = vpop.f32.mrf.mxu0 }
  0xdf   :  { %v426_v0 = vadd.f32 %v425_v63, %v867_v22  ;;  %v474_v1 = vpop.f32.mrf.mxu3  ;;  %v331_v3 = vadd.f32 %v330_v2, %v864_v17  ;;  %v379_v4 = vpop.f32.mrf.mxu1 }
  0xe1   :  { %v475_v5 = vadd.f32 %v474_v1, %v426_v0  ;;  %v380_v6 = vadd.f32 %v379_v4, %v331_v3 }
  0xe3   :  { %513 = vst [vmem:[#allocation8 + $0x58] sm:$0xff] %v475_v5 }
  0xe4   :  { %514 = vst [vmem:[#allocation8 + $0x60] sm:$0xff] %v380_v6 }
  0xe6   :  { %v428_v7 = vpop.f32.mrf.mxu2  ;;  %v332_v10 = vpop.f32.mrf.mxu0 }
  0xe7   :  { %v429_v8 = vadd.f32 %v428_v7, %v867_v22  ;;  %v477_v9 = vpop.f32.mrf.mxu3  ;;  %v333_v11 = vadd.f32 %v332_v10, %v864_v17  ;;  %v381_v12 = vpop.f32.mrf.mxu1 }
  0xe9   :  { %v478_v13 = vadd.f32 %v477_v9, %v429_v8  ;;  %v382_v14 = vadd.f32 %v381_v12, %v333_v11 }
  0xeb   :  { %515 = vst [vmem:[#allocation8 + $0x68] sm:$0xff] %v478_v13 }
  0xec   :  { %516 = vst [vmem:[#allocation8 + $0x70] sm:$0xff] %v382_v14 }
  0xee   :  { %v430_v15 = vpop.f32.mrf.mxu2  ;;  %v335_v19 = vpop.f32.mrf.mxu0 }
  0xef   :  { %v431_v16 = vadd.f32 %v430_v15, %v867_v22  ;;  %v479_v18 = vpop.f32.mrf.mxu3  ;;  %v336_v20 = vadd.f32 %v335_v19, %v864_v17  ;;  %v384_v21 = vpop.f32.mrf.mxu1 }
  0xf1   :  { %v480_v23 = vadd.f32 %v479_v18, %v431_v16  ;;  %v385_v24 = vadd.f32 %v384_v21, %v336_v20 }
  0xf3   :  { %517 = vst [vmem:[#allocation8 + $0x78] sm:$0xff] %v480_v23 }
  0xf4   :  { %518 = vst [vmem:[#allocation8 + $0x80] sm:$0xff] %v385_v24 }
  0xf6   :  { %v433_v25 = vpop.f32.mrf.mxu2  ;;  %v337_v28 = vpop.f32.mrf.mxu0 }
  0xf7   :  { %v434_v26 = vadd.f32 %v433_v25, %v867_v22  ;;  %v482_v27 = vpop.f32.mrf.mxu3  ;;  %v338_v29 = vadd.f32 %v337_v28, %v864_v17  ;;  %v386_v30 = vpop.f32.mrf.mxu1 }
  0xf9   :  { %v483_v31 = vadd.f32 %v482_v27, %v434_v26  ;;  %v387_v32 = vadd.f32 %v386_v30, %v338_v29 }
  0xfb   :  { %519 = vst [vmem:[#allocation8 + $0x88] sm:$0xff] %v483_v31 }
  0xfc   :  { %520 = vst [vmem:[#allocation8 + $0x90] sm:$0xff] %v387_v32 }
  0xfe   :  { %v435_v33 = vpop.f32.mrf.mxu2  ;;  %v340_v36 = vpop.f32.mrf.mxu0 }
  0xff   :  { %v436_v34 = vadd.f32 %v435_v33, %v867_v22  ;;  %v484_v35 = vpop.f32.mrf.mxu3  ;;  %v341_v37 = vadd.f32 %v340_v36, %v864_v17  ;;  %v389_v38 = vpop.f32.mrf.mxu1 }
 0x101   :  { %v485_v39 = vadd.f32 %v484_v35, %v436_v34  ;;  %v390_v40 = vadd.f32 %v389_v38, %v341_v37 }
 0x103   :  { %521 = vst [vmem:[#allocation8 + $0x98] sm:$0xff] %v485_v39 }
 0x104   :  { %522 = vst [vmem:[#allocation8 + $0xa0] sm:$0xff] %v390_v40 }
 0x106   :  { %v438_v41 = vpop.f32.mrf.mxu2  ;;  %v342_v44 = vpop.f32.mrf.mxu0 }
 0x107   :  { %v439_v42 = vadd.f32 %v438_v41, %v867_v22  ;;  %v487_v43 = vpop.f32.mrf.mxu3  ;;  %v343_v45 = vadd.f32 %v342_v44, %v864_v17  ;;  %v391_v46 = vpop.f32.mrf.mxu1 }
 0x109   :  { %v488_v47 = vadd.f32 %v487_v43, %v439_v42  ;;  %v392_v48 = vadd.f32 %v391_v46, %v343_v45 }
 0x10b   :  { %523 = vst [vmem:[#allocation8 + $0xa8] sm:$0xff] %v488_v47 }
 0x10c   :  { %524 = vst [vmem:[#allocation8 + $0xb0] sm:$0xff] %v392_v48 }
 0x10e   :  { %v440_v49 = vpop.f32.mrf.mxu2  ;;  %v345_v52 = vpop.f32.mrf.mxu0 }
 0x10f   :  { %v441_v50 = vadd.f32 %v440_v49, %v867_v22  ;;  %v489_v51 = vpop.f32.mrf.mxu3  ;;  %v346_v53 = vadd.f32 %v345_v52, %v864_v17  ;;  %v394_v54 = vpop.f32.mrf.mxu1 }
 0x111   :  { %v490_v55 = vadd.f32 %v489_v51, %v441_v50  ;;  %v395_v56 = vadd.f32 %v394_v54, %v346_v53 }
 0x113   :  { %525 = vst [vmem:[#allocation8 + $0xb8] sm:$0xff] %v490_v55 }
 0x114   :  { %526 = vst [vmem:[#allocation8 + $0xc0] sm:$0xff] %v395_v56 }
 0x116   :  { %v443_v57 = vpop.f32.mrf.mxu2  ;;  %v347_v60 = vpop.f32.mrf.mxu0 }
 0x117   :  { %v444_v58 = vadd.f32 %v443_v57, %v867_v22  ;;  %v492_v59 = vpop.f32.mrf.mxu3  ;;  %v348_v61 = vadd.f32 %v347_v60, %v864_v17  ;;  %v396_v62 = vpop.f32.mrf.mxu1 }
 0x119   :  { %v493_v63 = vadd.f32 %v492_v59, %v444_v58  ;;  %v397_v0 = vadd.f32 %v396_v62, %v348_v61 }
 0x11b   :  { %527 = vst [vmem:[#allocation8 + $0xc8] sm:$0xff] %v493_v63 }
 0x11c   :  { %528 = vst [vmem:[#allocation8 + $0xd0] sm:$0xff] %v397_v0 }
 0x11e   :  { %v445_v1 = vpop.f32.mrf.mxu2  ;;  %v350_v4 = vpop.f32.mrf.mxu0 }
 0x11f   :  { %v446_v2 = vadd.f32 %v445_v1, %v867_v22  ;;  %v494_v3 = vpop.f32.mrf.mxu3  ;;  %v351_v5 = vadd.f32 %v350_v4, %v864_v17  ;;  %v399_v6 = vpop.f32.mrf.mxu1 }
 0x121   :  { %v495_v7 = vadd.f32 %v494_v3, %v446_v2  ;;  %v400_v8 = vadd.f32 %v399_v6, %v351_v5 }
 0x123   :  { %529 = vst [vmem:[#allocation8 + $0xd8] sm:$0xff] %v495_v7 }
 0x124   :  { %530 = vst [vmem:[#allocation8 + $0xe0] sm:$0xff] %v400_v8 }
 0x126   :  { %v448_v9 = vpop.f32.mrf.mxu2  ;;  %v352_v12 = vpop.f32.mrf.mxu0 }
 0x127   :  { %v449_v10 = vadd.f32 %v448_v9, %v867_v22  ;;  %v497_v11 = vpop.f32.mrf.mxu3  ;;  %v353_v13 = vadd.f32 %v352_v12, %v864_v17  ;;  %v401_v15 = vpop.f32.mrf.mxu1 }
 0x129   :  { %v498_v14 = vadd.f32 %v497_v11, %v449_v10  ;;  %v402_v16 = vadd.f32 %v401_v15, %v353_v13 }
 0x12b   :  { %531 = vst [vmem:[#allocation8 + $0xe8] sm:$0xff] %v498_v14 }
 0x12c   :  { %532 = vst [vmem:[#allocation8 + $0xf0] sm:$0xff] %v402_v16 }
 0x12e   :  { %v450_v18 = vpop.f32.mrf.mxu2 }
 0x12f   :  { %v451_v19 = vadd.f32 %v450_v18, %v867_v22  ;;  %v499_v20 = vpop.f32.mrf.mxu3 }
 0x131   :  { %v500_v21 = vadd.f32 %v499_v20, %v451_v19 }
 0x133   :  { %533 = vst [vmem:[#allocation8 + $0xf8] sm:$0xff] %v500_v21 }
 0x134   :  { %546 = dma.vmem_to_hbm [thread:$0]  %s539_s29, 4096, %s541_s5, [#allocation4], %s828_s24, %s828_s24, %s829_s25  }
 0x135   :  { %822 = dma.done.wait [#allocation4], 4096  }
 0x136   :  { %823 = vsyncadd [#allocation4], 4294963200 }
 0x137   :  { %551 = vsyncpa [#allocation3], 1 }
 0x138   :  { %552 = vsyncpa [#allocation6], 1 }
 0x139   :  { %553 = vsyncpa [#allocation4], 1 }

</bundles_post_ra>
